<compile_context>
chip_gen: v7x
topology: tpu7x:2x2x1
jax: 0.10.0
libtpu: 0.0.40
codegen_flags: <defaults>
</compile_context>

<pallas_src>
import functools

import jax
import jax.numpy as jnp
from jax.experimental import pallas as pl
from jax.experimental.pallas import tpu as pltpu

LANE = 128      # vreg lane width: pad all feature dims to a multiple of this
SUBLANE = 8


def _round_up(n, m):
    return ((n + m - 1) // m) * m


def _fcnn_kernel(x_ref, w1_ref, b1_ref, w2_ref, b2_ref, w3_ref, b3_ref, o_ref):
    """Fused 3-layer MLP on one batch tile: (Linear+ReLU) x2 -> Linear.

    Dots run on the MXU in the weights' dtype (bf16 on v6e/v7x) with f32
    accumulation; bias add + ReLU stay f32 on the VPU.
    """
    h = jnp.dot(x_ref[...], w1_ref[...],
                preferred_element_type=jnp.float32) + b1_ref[...]
    h = jnp.maximum(h, 0.0)                      # ReLU (dropout = identity in eval)

    w2 = w2_ref[...]
    h = jnp.dot(h.astype(w2.dtype), w2,
                preferred_element_type=jnp.float32) + b2_ref[...]
    h = jnp.maximum(h, 0.0)                      # ReLU (dropout = identity in eval)

    w3 = w3_ref[...]
    out = jnp.dot(h.astype(w3.dtype), w3,
                  preferred_element_type=jnp.float32) + b3_ref[...]
    o_ref[...] = out.astype(o_ref.dtype)


def _pad_params(params, compute_dtype):
    """Zero-pad all feature dims to multiples of LANE; cast weights to compute_dtype.

    Zero rows/cols contribute exactly 0 to every dot product and ReLU(0)=0, so
    padding does not change the math; padded output columns are sliced off later.
    Biases stay f32 (they feed the f32 VPU add).
    """
    padded = {}
    for idx in (1, 2, 3):
        w = params[f"w{idx}"]
        b = params[f"b{idx}"]
        k_p = _round_up(w.shape[0], LANE)
        n_p = _round_up(w.shape[1], LANE)
        padded[f"w{idx}"] = jnp.pad(
            w, ((0, k_p - w.shape[0]), (0, n_p - w.shape[1]))).astype(compute_dtype)
        padded[f"b{idx}"] = jnp.pad(b, ((0, 0), (0, n_p - b.shape[1])))
    return padded


@functools.partial(jax.jit, static_argnames=("batch_tile", "compute_dtype"))
def fcnn_forward(x, params, *, batch_tile=None, compute_dtype=jnp.bfloat16):
    """x: (B, input_size) f32. params: dict of w1,b1,w2,b2,w3,b3 (unpadded, f32)."""
    B, in_size = x.shape
    out_size = params["w3"].shape[1]

    p = _pad_params(params, compute_dtype)
    in_p, h1_p = p["w1"].shape
    h2_p = p["w2"].shape[1]
    out_p = p["w3"].shape[1]

    # Batch tile: as large as practical while keeping grid >= 2 (v7x megacore);
    # per-step VMEM for x/out tiles is tiny at these widths even at 1024 rows.
    if batch_tile is None:
        batch_tile = max(SUBLANE, min(1024, pl.next_power_of_2(pl.cdiv(B, 2))))
    B_pad = _round_up(B, batch_tile)
    grid = (B_pad // batch_tile,)

    xp = x
    if B_pad != B or in_p != in_size:
        xp = jnp.pad(x, ((0, B_pad - B), (0, in_p - in_size)))
    xp = xp.astype(compute_dtype)               # halves x HBM traffic on bf16 path

    itemsize = jnp.dtype(compute_dtype).itemsize
    w_elems = in_p * h1_p + h1_p * h2_p + h2_p * out_p
    cost = pl.CostEstimate(
        flops=2 * B_pad * w_elems,
        transcendentals=0,
        bytes_accessed=(B_pad * in_p * itemsize          # x
                        + w_elems * itemsize             # weights
                        + (h1_p + h2_p + out_p) * 4      # biases (f32)
                        + B_pad * out_p * 4),            # output (f32)
    )

    full = lambda shape: pl.BlockSpec(shape, lambda i: (0, 0))

    # NOTE: weights are fully VMEM-resident (Pallas double-buffers them) — fine at
    # these widths.  TODO(synk): tile weights over an extra "arbitrary" grid axis
    # and set vmem_limit_bytes if hidden sizes grow to ~4k.
    out_padded = pl.pallas_call(
        _fcnn_kernel,
        out_shape=jax.ShapeDtypeStruct((B_pad, out_p), jnp.float32),
        grid=grid,
        in_specs=[
            pl.BlockSpec((batch_tile, in_p), lambda i: (i, 0)),   # x tile
            full((in_p, h1_p)), full((1, h1_p)),                  # layer 1
            full((h1_p, h2_p)), full((1, h2_p)),                  # layer 2
            full((h2_p, out_p)), full((1, out_p)),                # output layer
        ],
        out_specs=pl.BlockSpec((batch_tile, out_p), lambda i: (i, 0)),
        compiler_params=pltpu.CompilerParams(
            dimension_semantics=("parallel",)),
        cost_estimate=cost,
    )(xp, p["w1"], p["b1"], p["w2"], p["b2"], p["w3"], p["b3"])

    return out_padded[:B, :out_size]


def init_params(key, input_size, hidden_sizes, output_size):
    """Deterministic PyTorch-style uniform(-1/sqrt(fan_in), 1/sqrt(fan_in)) init."""
    sizes = [input_size] + list(hidden_sizes) + [output_size]
    params = {}
    for idx in range(len(sizes) - 1):
        fan_in, fan_out = sizes[idx], sizes[idx + 1]
        key, kw, kb = jax.random.split(key, 3)
        bound = 1.0 / (fan_in ** 0.5)
        params[f"w{idx + 1}"] = jax.random.uniform(
            kw, (fan_in, fan_out), jnp.float32, -bound, bound)
        params[f"b{idx + 1}"] = jax.random.uniform(
            kb, (1, fan_out), jnp.float32, -bound, bound)
    return params


def fcnn_reference(x, params, compute_dtype=jnp.float32):
    """Pure-JAX reference; operands cast to compute_dtype, f32 accumulation."""
    cd = compute_dtype
    h = jnp.dot(x.astype(cd), params["w1"].astype(cd),
                preferred_element_type=jnp.float32) + params["b1"]
    h = jnp.maximum(h, 0.0)
    h = jnp.dot(h.astype(cd), params["w2"].astype(cd),
                preferred_element_type=jnp.float32) + params["b2"]
    h = jnp.maximum(h, 0.0)
    return jnp.dot(h.astype(cd), params["w3"].astype(cd),
                   preferred_element_type=jnp.float32) + params["b3"]


if __name__ == "__main__":
    # Hyper-params consistent with FCNNModel(input_size, output_size, hidden_sizes, dropout).
    input_size, output_size = 32, 16
    hidden_sizes = (64, 64)
    dropout = 0.1  # noqa: F841  (identity in eval mode)
    batch = 256    # small, but gives a grid of >= 2 batch tiles (both v7x TCs busy)

    key = jax.random.PRNGKey(0)
    key, kx = jax.random.split(key)
    x = jax.random.normal(kx, (batch, input_size), jnp.float32)
    params = init_params(key, input_size, hidden_sizes, output_size)

    # bf16 MXU path (v6e/v7x sweet spot).
    out = jax.block_until_ready(fcnn_forward(x, params))
    assert out.shape == (batch, output_size)

    ref_bf16 = fcnn_reference(x, params, compute_dtype=jnp.bfloat16)
    ref_f32 = fcnn_reference(x, params, compute_dtype=jnp.float32)
    assert jnp.allclose(out, ref_bf16, atol=1e-3, rtol=1e-3), "mismatch vs bf16 reference"
    assert jnp.allclose(out, ref_f32, atol=1e-1, rtol=1e-1), "mismatch vs f32 reference (loose)"

    # Full-precision path (exact vs f32 reference) — also what v5e would prefer.
    out_f32 = jax.block_until_ready(
        fcnn_forward(x, params, compute_dtype=jnp.float32))
    assert jnp.allclose(out_f32, ref_f32, atol=1e-5, rtol=1e-5), "mismatch vs f32 reference"

    print("KERNEL_OK")
</pallas_src>

<mosaic_0001>
module attributes {stable_mosaic.version = 11 : i64} {
  func.func @_fcnn_kernel(%arg0: i32, %arg1: memref<128x128xbf16, #tpu.memory_space<vmem>>, %arg2: memref<128x128xbf16, #tpu.memory_space<vmem>>, %arg3: memref<1x128xf32, #tpu.memory_space<vmem>>, %arg4: memref<128x128xbf16, #tpu.memory_space<vmem>>, %arg5: memref<1x128xf32, #tpu.memory_space<vmem>>, %arg6: memref<128x128xbf16, #tpu.memory_space<vmem>>, %arg7: memref<1x128xf32, #tpu.memory_space<vmem>>, %arg8: memref<128x128xf32, #tpu.memory_space<vmem>>) attributes {dimension_semantics = [#tpu.dimension_semantics<parallel>], iteration_bounds = array<i64: 2>, scalar_prefetch = 0 : i64, scratch_operands = 0 : i64, tpu.core_type = #tpu.core_type<tc>, window_params = [{transform_indices = @transform_0, window_bounds = array<i64: 128, 128>}, {pipeline_mode = #tpu.pipeline_mode<synchronous>, transform_indices = @transform_1, window_bounds = array<i64: 128, 128>}, {pipeline_mode = #tpu.pipeline_mode<synchronous>, transform_indices = @transform_2, window_bounds = array<i64: 1, 128>}, {pipeline_mode = #tpu.pipeline_mode<synchronous>, transform_indices = @transform_3, window_bounds = array<i64: 128, 128>}, {pipeline_mode = #tpu.pipeline_mode<synchronous>, transform_indices = @transform_4, window_bounds = array<i64: 1, 128>}, {pipeline_mode = #tpu.pipeline_mode<synchronous>, transform_indices = @transform_5, window_bounds = array<i64: 128, 128>}, {pipeline_mode = #tpu.pipeline_mode<synchronous>, transform_indices = @transform_6, window_bounds = array<i64: 1, 128>}, {transform_indices = @transform_7, window_bounds = array<i64: 128, 128>}]} {
    %c0 = arith.constant 0 : index
    %c0_0 = arith.constant 0 : index
    %0 = vector.load %arg1[%c0, %c0_0] : memref<128x128xbf16, #tpu.memory_space<vmem>>, vector<128x128xbf16>
    %c0_1 = arith.constant 0 : index
    %c0_2 = arith.constant 0 : index
    %1 = vector.load %arg2[%c0_1, %c0_2] : memref<128x128xbf16, #tpu.memory_space<vmem>>, vector<128x128xbf16>
    %cst = arith.constant dense<0.000000e+00> : vector<128x128xf32>
    %2 = tpu.matmul %0, %1, %cst {dimension_numbers = #tpu.dot_dimension_numbers<[1], [0], [0], [1], [0, 0, 1, 1], [], []>} : vector<128x128xbf16>, vector<128x128xbf16>, vector<128x128xf32> -> vector<128x128xf32>
    %c0_3 = arith.constant 0 : index
    %c0_4 = arith.constant 0 : index
    %3 = vector.load %arg3[%c0_3, %c0_4] : memref<1x128xf32, #tpu.memory_space<vmem>>, vector<1x128xf32>
    %4 = vector.broadcast %3 : vector<1x128xf32> to vector<128x128xf32>
    %5 = arith.addf %2, %4 : vector<128x128xf32>
    %cst_5 = arith.constant 0.000000e+00 : f32
    %6 = vector.broadcast %cst_5 : f32 to vector<128x128xf32>
    %7 = arith.maximumf %5, %6 : vector<128x128xf32>
    %c0_6 = arith.constant 0 : index
    %c0_7 = arith.constant 0 : index
    %8 = vector.load %arg4[%c0_6, %c0_7] : memref<128x128xbf16, #tpu.memory_space<vmem>>, vector<128x128xbf16>
    %9 = arith.truncf %7 : vector<128x128xf32> to vector<128x128xbf16>
    %cst_8 = arith.constant dense<0.000000e+00> : vector<128x128xf32>
    %10 = tpu.matmul %9, %8, %cst_8 {dimension_numbers = #tpu.dot_dimension_numbers<[1], [0], [0], [1], [0, 0, 1, 1], [], []>} : vector<128x128xbf16>, vector<128x128xbf16>, vector<128x128xf32> -> vector<128x128xf32>
    %c0_9 = arith.constant 0 : index
    %c0_10 = arith.constant 0 : index
    %11 = vector.load %arg5[%c0_9, %c0_10] : memref<1x128xf32, #tpu.memory_space<vmem>>, vector<1x128xf32>
    %12 = vector.broadcast %11 : vector<1x128xf32> to vector<128x128xf32>
    %13 = arith.addf %10, %12 : vector<128x128xf32>
    %cst_11 = arith.constant 0.000000e+00 : f32
    %14 = vector.broadcast %cst_11 : f32 to vector<128x128xf32>
    %15 = arith.maximumf %13, %14 : vector<128x128xf32>
    %c0_12 = arith.constant 0 : index
    %c0_13 = arith.constant 0 : index
    %16 = vector.load %arg6[%c0_12, %c0_13] : memref<128x128xbf16, #tpu.memory_space<vmem>>, vector<128x128xbf16>
    %17 = arith.truncf %15 : vector<128x128xf32> to vector<128x128xbf16>
    %cst_14 = arith.constant dense<0.000000e+00> : vector<128x128xf32>
    %18 = tpu.matmul %17, %16, %cst_14 {dimension_numbers = #tpu.dot_dimension_numbers<[1], [0], [0], [1], [0, 0, 1, 1], [], []>} : vector<128x128xbf16>, vector<128x128xbf16>, vector<128x128xf32> -> vector<128x128xf32>
    %c0_15 = arith.constant 0 : index
    %c0_16 = arith.constant 0 : index
    %19 = vector.load %arg7[%c0_15, %c0_16] : memref<1x128xf32, #tpu.memory_space<vmem>>, vector<1x128xf32>
    %20 = vector.broadcast %19 : vector<1x128xf32> to vector<128x128xf32>
    %21 = arith.addf %18, %20 : vector<128x128xf32>
    %c0_17 = arith.constant 0 : index
    %c0_18 = arith.constant 0 : index
    %22 = vector.load %arg8[%c0_17, %c0_18] : memref<128x128xf32, #tpu.memory_space<vmem>>, vector<128x128xf32>
    tpu.vector_store %arg8[%c0_17, %c0_18], %21 {strides = array<i32>} : memref<128x128xf32, #tpu.memory_space<vmem>>, vector<128x128xf32>,
    return
  }
  func.func @transform_0(%arg0: i32) -> (i32, i32) {
    %c0_i32 = arith.constant 0 : i32
    %c0_i32_0 = arith.constant 0 : i32
    return %arg0, %c0_i32 : i32, i32
  }
  func.func @transform_1(%arg0: i32) -> (i32, i32) {
    %c0_i32 = arith.constant 0 : i32
    %c0_i32_0 = arith.constant 0 : i32
    %c0_i32_1 = arith.constant 0 : i32
    return %c0_i32, %c0_i32_0 : i32, i32
  }
  func.func @transform_2(%arg0: i32) -> (i32, i32) {
    %c0_i32 = arith.constant 0 : i32
    %c0_i32_0 = arith.constant 0 : i32
    %c0_i32_1 = arith.constant 0 : i32
    return %c0_i32, %c0_i32_0 : i32, i32
  }
  func.func @transform_3(%arg0: i32) -> (i32, i32) {
    %c0_i32 = arith.constant 0 : i32
    %c0_i32_0 = arith.constant 0 : i32
    %c0_i32_1 = arith.constant 0 : i32
    return %c0_i32, %c0_i32_0 : i32, i32
  }
  func.func @transform_4(%arg0: i32) -> (i32, i32) {
    %c0_i32 = arith.constant 0 : i32
    %c0_i32_0 = arith.constant 0 : i32
    %c0_i32_1 = arith.constant 0 : i32
    return %c0_i32, %c0_i32_0 : i32, i32
  }
  func.func @transform_5(%arg0: i32) -> (i32, i32) {
    %c0_i32 = arith.constant 0 : i32
    %c0_i32_0 = arith.constant 0 : i32
    %c0_i32_1 = arith.constant 0 : i32
    return %c0_i32, %c0_i32_0 : i32, i32
  }
  func.func @transform_6(%arg0: i32) -> (i32, i32) {
    %c0_i32 = arith.constant 0 : i32
    %c0_i32_0 = arith.constant 0 : i32
    %c0_i32_1 = arith.constant 0 : i32
    return %c0_i32, %c0_i32_0 : i32, i32
  }
  func.func @transform_7(%arg0: i32) -> (i32, i32) {
    %c0_i32 = arith.constant 0 : i32
    %c0_i32_0 = arith.constant 0 : i32
    return %arg0, %c0_i32 : i32, i32
  }
}

</mosaic_0001>

<bundles_post_ra>
// kernel: fcnn_forward.1
= control target key start
LH: loop header
LB: loop body
LE: loop exit
PB: predicated region body
PF: predicated region fallthrough
CT: control target
= control target key end

     0   :  { %s1265_s24 = smov 0   ;;  %s1431_s0 = inlined_call_operand.vmem [shape: bf16[256,128], index: 0, kind: input, shape index: {}]   ;;  %s1432_s1 = inlined_call_operand.vmem [shape: bf16[128,128], index: 1, kind: input, shape index: {}]   ;;  %s1433_s2 = inlined_call_operand.vmem [shape: f32[1,128], index: 2, kind: input, shape index: {}]   ;;  %s1434_s3 = inlined_call_operand.vmem [shape: bf16[128,128], index: 3, kind: input, shape index: {}]   ;;  %s1435_s4 = inlined_call_operand.vmem [shape: f32[1,128], index: 4, kind: input, shape index: {}]   ;;  %s1436_s5 = inlined_call_operand.vmem [shape: bf16[128,128], index: 5, kind: input, shape index: {}]   ;;  %s1437_s6 = inlined_call_operand.vmem [shape: f32[1,128], index: 6, kind: input, shape index: {}]   ;;  %s1438_s7 = inlined_call_operand.vmem [shape: f32[256,128], index: 7, kind: output, shape index: {}]  }
   0x1 LB: > { %s971_s25 = sadd.s32 4294967295, %s1223_s24   ;;  %p975_p0 = scmp.ge.s32.totalorder %s1223_s24, 1  ;;  %s1223_s24 = sphi %s1265_s24, %s17_s24  }
   0x2   : > { %p238_p1 = scmp.lt.s32.totalorder %s1223_s24, 3 }
   0x4   : > { %p239_p2 = pnand %p975_p0, %p238_p1 }
   0x5   : > { %v1185_v0 = vld [vmem:[%s1432_s1] sm:$0xff] (!%p239_p2)   ;;  %s976_s28 = sshll.u32 (!%p239_p2), %s971_s25, 4  ;;  %v1186_v1 = vld [vmem:[%s1432_s1 + $0x8] sm:$0xff] (!%p239_p2)   ;;  %v1187_v2 = vld [vmem:[%s1432_s1 + $0x10] sm:$0xff] (!%p239_p2)  }
   0x6   : > { %242 = sbr.rel (%p239_p2) target bundleno = 724 (0x2d4), region = 48  ;;  %p271_p3 = scmp.lt.s32.totalorder (!%p239_p2), %s976_s28, 31  ;;  %1065 = vmatprep.subr.bf16.mxu0 (!%p239_p2), %v1185_v0  ;;  %v1188_v3 = vld [vmem:[%s1432_s1 + $0x18] sm:$0xff] (!%p239_p2)   ;;  %v1189_v5 = vld [vmem:[%s1432_s1 + $0x20] sm:$0xff] (!%p239_p2)   ;;  %v1190_v6 = vld [vmem:[%s1432_s1 + $0x28] sm:$0xff] (!%p239_p2)  }
   0x7   : > { %1066 = vmatpush3.bf16.msra.mxu0 (!%p239_p2), %v1185_v0  ;;  %v1201_v7 = vld [vmem:[%s1434_s3] sm:$0xff] (!%p239_p2)   ;;  %v1202_v8 = vld [vmem:[%s1434_s3 + $0x8] sm:$0xff] (!%p239_p2)   ;;  %v1191_v9 = vld [vmem:[%s1432_s1 + $0x30] sm:$0xff] (!%p239_p2)  }
   0x8   : > { %1067 = vmatprep.subr.bf16.mxu0 (!%p239_p2), %v1186_v1  ;;  %1097 = vmatprep.subr.bf16.mxu1 (!%p239_p2), %v1201_v7  ;;  %v1203_v10 = vld [vmem:[%s1434_s3 + $0x10] sm:$0xff] (!%p239_p2)   ;;  %v1192_v11 = vld [vmem:[%s1432_s1 + $0x38] sm:$0xff] (!%p239_p2)   ;;  %v1205_v13 = vld [vmem:[%s1434_s3 + $0x20] sm:$0xff] (!%p239_p2)  }
   0x9   : > { %1098 = vmatpush3.bf16.msra.mxu1 (!%p239_p2), %v1201_v7  ;;  %v1204_v12 = vld [vmem:[%s1434_s3 + $0x18] sm:$0xff] (!%p239_p2)   ;;  %v1206_v16 = vld [vmem:[%s1434_s3 + $0x28] sm:$0xff] (!%p239_p2)   ;;  %v1207_v22 = vld [vmem:[%s1434_s3 + $0x30] sm:$0xff] (!%p239_p2)  }
   0xa   : > { %1099 = vmatprep.subr.bf16.mxu1 (!%p239_p2), %v1202_v8  ;;  %v1208_v23 = vld [vmem:[%s1434_s3 + $0x38] sm:$0xff] (!%p239_p2)   ;;  %v1209_v24 = vld [vmem:[%s1436_s5] sm:$0xff] (!%p239_p2)   ;;  %v1210_v25 = vld [vmem:[%s1436_s5 + $0x8] sm:$0xff] (!%p239_p2)  }
   0xb   : > { %1068 = vmatpush3.bf16.msra.mxu0 (!%p239_p2), %v1186_v1  ;;  %v1211_v26 = vld [vmem:[%s1436_s5 + $0x10] sm:$0xff] (!%p239_p2)   ;;  %v1349_v27 = vld [vmem:[%s1436_s5 + $0x18] sm:$0xff] (!%p239_p2)   ;;  %v1355_v28 = vld [vmem:[%s1436_s5 + $0x20] sm:$0xff] (!%p239_p2)  }
   0xc   : > { %1069 = vmatprep.subr.bf16.mxu0 (!%p239_p2), %v1187_v2  ;;  %v1362_v29 = vld [vmem:[%s1436_s5 + $0x28] sm:$0xff] (!%p239_p2)   ;;  %v1370_v30 = vld [vmem:[%s1433_s2] ss:$0 sm:$0xff] (!%p239_p2) }
   0xd   : > { %s1440_s28 = smov (!%p271_p3, %s976_s28), 31  ;;  %1100 = vmatpush3.bf16.msra.mxu1 %v1202_v8 }
   0xe   : > { %s977_s10 = sshll.u32 %s1440_s28, 2  ;;  %1101 = vmatprep.subr.bf16.mxu1 %v1203_v10  ;;  %s979_s19 = sshll.u32 %s1440_s28, 3 }
   0xf   : > { %s1288_s13 = scalar_lea.vmem %s1431_s0, %s977_s10  ;;  %1070 = vmatpush3.bf16.msra.mxu0 %v1187_v2 }
  0x10   : > { %v1193_v4 = vld [vmem:[%s1288_s13] sm:$0xff]   ;;  %1071 = vmatprep.subr.bf16.mxu0 %v1188_v3  ;;  %v1194_v14 = vld [vmem:[%s1288_s13 + $0x8] sm:$0xff]   ;;  %v1195_v15 = vld [vmem:[%s1288_s13 + $0x10] sm:$0xff]  }
  0x11   : > { %1081 = vmatprep.mubr.bf16.mxu0 %v1193_v4  ;;  %1102 = vmatpush3.bf16.msra.mxu1 %v1203_v10  ;;  %v1196_v17 = vld [vmem:[%s1288_s13 + $0x18] sm:$0xff]   ;;  %v1197_v18 = vld [vmem:[%s1288_s13 + $0x20] sm:$0xff]   ;;  %v1198_v19 = vld [vmem:[%s1288_s13 + $0x28] sm:$0xff]  }
  0x12   : > { %1103 = vmatprep.subr.bf16.mxu1 %v1204_v12  ;;  %v1199_v20 = vld [vmem:[%s1288_s13 + $0x30] sm:$0xff]   ;;  %v1200_v21 = vld [vmem:[%s1288_s13 + $0x38] sm:$0xff]   ;;  %s1410_s13 = scalar_lea.vmem %s1438_s7, %s979_s19 }
  0x13   : > { %1072 = vmatpush3.bf16.msra.mxu0 %v1188_v3 }
  0x14   : > { %1073 = vmatprep.subr.bf16.mxu0 %v1189_v5 }
  0x15   : > { %1104 = vmatpush3.bf16.msra.mxu1 %v1204_v12 }
  0x16   : > { %1105 = vmatprep.subr.bf16.mxu1 %v1205_v13 }
  0x17   : > { %1074 = vmatpush3.bf16.msra.mxu0 %v1189_v5 }
  0x18   : > { %1075 = vmatprep.subr.bf16.mxu0 %v1190_v6 }
  0x19   : > { %1106 = vmatpush3.bf16.msra.mxu1 %v1205_v13 }
  0x1a   : > { %1107 = vmatprep.subr.bf16.mxu1 %v1206_v16 }
  0x1b   : > { %1076 = vmatpush3.bf16.msra.mxu0 %v1190_v6 }
  0x1c   : > { %1077 = vmatprep.subr.bf16.mxu0 %v1191_v9 }
  0x1d   : > { %1108 = vmatpush3.bf16.msra.mxu1 %v1206_v16 }
  0x1e   : > { %1109 = vmatprep.subr.bf16.mxu1 %v1207_v22 }
  0x1f   : > { %1078 = vmatpush3.bf16.msra.mxu0 %v1191_v9 }
  0x20   : > { %1079 = vmatprep.subr.bf16.mxu0 %v1192_v11 }
  0x21   : > { %1110 = vmatpush3.bf16.msra.mxu1 %v1207_v22 }
  0x22   : > { %1111 = vmatprep.subr.bf16.mxu1 %v1208_v23 }
  0x23   : > { %1080 = vmatpush3.bf16.msra.mxu0 %v1192_v11 }
  0x24   : > { %1129 = vmatprep.subr.bf16.mxu0 %v1209_v24 }
  0x25   : > { %1112 = vmatpush3.bf16.msra.mxu1 %v1208_v23  ;;  %v1215_v23 = vld [vmem:[%s1436_s5 + $0x30] sm:$0xff]  }
  0x26   : > { %1082 = vmatmul.mubr.bf16.vlgmr.msra.gmra.mrb[0].mxu0 %v1194_v14  ;;  %1161 = vmatprep.subr.bf16.mxu1 %v1209_v24 }
  0x27   : > { %1085 = vmatprep.mubr.bf16.mxu0 %v1195_v15  ;;  %1130 = vmatpush3.bf16.msra.mxu0 %v1209_v24 }
  0x28   : > { %1131 = vmatprep.subr.bf16.mxu0 %v1210_v25 }
  0x2b   : > { %1132 = vmatpush3.bf16.msra.mxu0 %v1210_v25 }
  0x2c   : > { %1133 = vmatprep.subr.bf16.mxu0 %v1211_v26 }
  0x2e   : > { %1086 = vmatmul.mubr.bf16.gmra.mrb[4].mxu0 %v1196_v17 }
  0x2f   : > { %1089 = vmatprep.mubr.bf16.mxu0 %v1197_v18  ;;  %1134 = vmatpush3.bf16.msra.mxu0 %v1211_v26 }
  0x30   : > { %1135 = vmatprep.subr.bf16.mxu0 %v1349_v27 }
  0x33   : > { %1136 = vmatpush3.bf16.msra.mxu0 %v1349_v27 }
  0x34   : > { %1137 = vmatprep.subr.bf16.mxu0 %v1355_v28 }
  0x36   : > { %1090 = vmatmul.mubr.bf16.gmra.mrb[8].mxu0 %v1198_v19 }
  0x37   : > { %1093 = vmatprep.mubr.bf16.mxu0 %v1199_v20  ;;  %1138 = vmatpush3.bf16.msra.mxu0 %v1355_v28 }
  0x38   : > { %1139 = vmatprep.subr.bf16.mxu0 %v1362_v29 }
  0x3b   : > { %1140 = vmatpush3.bf16.msra.mxu0 %v1362_v29 }
  0x3c   : > { %1141 = vmatprep.subr.bf16.mxu0 %v1215_v23 }
  0x3e   : > { %1094 = vmatmul.mubr.bf16.gmra.mrb[12].mxu0 %v1200_v21 }
  0x3f   : > { %1142 = vmatpush3.bf16.msra.mxu0 %v1215_v23 }
  0xf9   : > { %v1083_v31 = vpop.f32.mrb[0].mxu0 }
  0xfa   : > { %v461_v32 = vadd.f32 %v1083_v31, %v1370_v30  ;;  %v452_v33 = vpop.f32.mrb[1].mxu0 }
  0xfb   : > { %v453_v34 = vadd.f32 %v1370_v30, %v452_v33  ;;  %v1084_v35 = vpop.f32.mrb[2].mxu0 }
  0xfc   : > { %v464_v36 = vadd.f32 %v1084_v35, %v1370_v30  ;;  %v455_v37 = vpop.f32.mrb[3].mxu0  ;;  %v517_v39 = vmax.f32 %v461_v32, 0.0 }
  0xfd   : > { %v456_v38 = vadd.f32 %v1370_v30, %v455_v37  ;;  %v515_v41 = vmax.f32 %v453_v34, 0.0 }
  0xfe   : > { %v518_v40 = vmax.f32 %v464_v36, 0.0 }
  0xff   : > { %v516_v42 = vmax.f32 %v456_v38, 0.0 }
 0x100   : > { %v548_v43 = vpack.c.bf16 %v518_v40, %v517_v39 }
 0x101   : > { %v1087_v44 = vpop.f32.mrb[4].mxu0  ;;  %v547_v45 = vpack.c.bf16 %v516_v42, %v515_v41 }
 0x102   : > { %v477_v46 = vadd.f32 %v1087_v44, %v1370_v30  ;;  %v468_v47 = vpop.f32.mrb[5].mxu0 }
 0x103   : > { %v469_v48 = vadd.f32 %v1370_v30, %v468_v47  ;;  %v1088_v49 = vpop.f32.mrb[6].mxu0  ;;  %1113 = vmatprep.mubr.bf16.mxu1 %v547_v45 }
 0x104   : > { %v480_v50 = vadd.f32 %v1088_v49, %v1370_v30  ;;  %v471_v51 = vpop.f32.mrb[7].mxu0  ;;  %1114 = vmatmul.mubr.bf16.vlgmr.msra.gmra.mrb[0].mxu1 %v548_v43  ;;  %v521_v53 = vmax.f32 %v477_v46, 0.0 }
 0x105   : > { %v472_v52 = vadd.f32 %v1370_v30, %v471_v51  ;;  %1169 = vmatpush3.bf16.msra.mxu1 %v1209_v24  ;;  %v519_v55 = vmax.f32 %v469_v48, 0.0  ;;  %v1216_v24 = vld [vmem:[%s1436_s5 + $0x38] sm:$0xff]  }
 0x106   : > { %v522_v54 = vmax.f32 %v480_v50, 0.0  ;;  %1162 = vmatprep.subr.bf16.mxu1 %v1210_v25  ;;  %1143 = vmatprep.subr.bf16.mxu0 %v1216_v24 }
 0x107   : > { %v520_v56 = vmax.f32 %v472_v52, 0.0  ;;  %1144 = vmatpush3.bf16.msra.mxu0 %v1216_v24 }
 0x108   : > { %v550_v57 = vpack.c.bf16 %v522_v54, %v521_v53 }
 0x109   : > { %v549_v58 = vpack.c.bf16 %v520_v56, %v519_v55  ;;  %v1091_v59 = vpop.f32.mrb[8].mxu0  ;;  %1170 = vmatpush3.bf16.msra.mxu1 %v1210_v25  ;;  %v997_v25 = vld [vmem:[%s1435_s4] ss:$0 sm:$0xff] }
 0x10a   : > { %v493_v60 = vadd.f32 %v1091_v59, %v1370_v30  ;;  %v484_v61 = vpop.f32.mrb[9].mxu0  ;;  %1163 = vmatprep.subr.bf16.mxu1 %v1211_v26 }
 0x10b   : > { %v485_v62 = vadd.f32 %v1370_v30, %v484_v61  ;;  %v1092_v63 = vpop.f32.mrb[10].mxu0  ;;  %1117 = vmatprep.mubr.bf16.mxu1 %v549_v58 }
 0x10c   : > { %v496_v0 = vadd.f32 %v1092_v63, %v1370_v30  ;;  %v487_v1 = vpop.f32.mrb[11].mxu0  ;;  %1118 = vmatmul.mubr.bf16.gmra.mrb[4].mxu1 %v550_v57  ;;  %v525_v3 = vmax.f32 %v493_v60, 0.0 }
 0x10d   : > { %v488_v2 = vadd.f32 %v1370_v30, %v487_v1  ;;  %1171 = vmatpush3.bf16.msra.mxu1 %v1211_v26  ;;  %v523_v5 = vmax.f32 %v485_v62, 0.0 }
 0x10e   : > { %v526_v4 = vmax.f32 %v496_v0, 0.0  ;;  %1164 = vmatprep.subr.bf16.mxu1 %v1349_v27 }
 0x10f   : > { %v524_v6 = vmax.f32 %v488_v2, 0.0 }
 0x110   : > { %v552_v7 = vpack.c.bf16 %v526_v4, %v525_v3 }
 0x111   : > { %v551_v8 = vpack.c.bf16 %v524_v6, %v523_v5  ;;  %v1095_v9 = vpop.f32.mrb[12].mxu0  ;;  %1172 = vmatpush3.bf16.msra.mxu1 %v1349_v27 }
 0x112   : > { %v509_v10 = vadd.f32 %v1095_v9, %v1370_v30  ;;  %v500_v11 = vpop.f32.mrb[13].mxu0  ;;  %1165 = vmatprep.subr.bf16.mxu1 %v1355_v28 }
 0x113   : > { %v501_v12 = vadd.f32 %v1370_v30, %v500_v11  ;;  %v1096_v13 = vpop.f32.mrb[14].mxu0  ;;  %1121 = vmatprep.mubr.bf16.mxu1 %v551_v8 }
 0x114   : > { %v512_v14 = vadd.f32 %v1096_v13, %v1370_v30  ;;  %v503_v15 = vpop.f32.mrb[15].mxu0  ;;  %1122 = vmatmul.mubr.bf16.gmra.mrb[8].mxu1 %v552_v7  ;;  %v529_v17 = vmax.f32 %v509_v10, 0.0 }
 0x115   : > { %v504_v16 = vadd.f32 %v1370_v30, %v503_v15  ;;  %1173 = vmatpush3.bf16.msra.mxu1 %v1355_v28  ;;  %v527_v19 = vmax.f32 %v501_v12, 0.0 }
 0x116   : > { %v530_v18 = vmax.f32 %v512_v14, 0.0  ;;  %1166 = vmatprep.subr.bf16.mxu1 %v1362_v29 }
 0x117   : > { %v528_v20 = vmax.f32 %v504_v16, 0.0 }
 0x118   : > { %v554_v21 = vpack.c.bf16 %v530_v18, %v529_v17  ;;  %v1006_v18 = vld [vmem:[%s1437_s6] ss:$0 sm:$0xff] }
 0x119   : > { %v553_v22 = vpack.c.bf16 %v528_v20, %v527_v19  ;;  %1174 = vmatpush3.bf16.msra.mxu1 %v1362_v29 }
 0x11a   : > { %1167 = vmatprep.subr.bf16.mxu1 %v1215_v23 }
 0x11b   : > { %1125 = vmatprep.mubr.bf16.mxu1 %v553_v22 }
 0x11c   : > { %1126 = vmatmul.mubr.bf16.gmra.mrb[12].mxu1 %v554_v21 }
 0x11d   : > { %1175 = vmatpush3.bf16.msra.mxu1 %v1215_v23 }
 0x11e   : > { %1168 = vmatprep.subr.bf16.mxu1 %v1216_v24 }
 0x121   : > { %1176 = vmatpush3.bf16.msra.mxu1 %v1216_v24 }
 0x1d7   : > { %v1115_v26 = vpop.f32.mrb[0].mxu1 }
 0x1d8   : > { %v653_v27 = vadd.f32 %v1115_v26, %v997_v25  ;;  %v644_v28 = vpop.f32.mrb[1].mxu1 }
 0x1d9   : > { %v645_v29 = vadd.f32 %v997_v25, %v644_v28  ;;  %v1116_v30 = vpop.f32.mrb[2].mxu1 }
 0x1da   : > { %v656_v31 = vadd.f32 %v1116_v30, %v997_v25  ;;  %v647_v32 = vpop.f32.mrb[3].mxu1  ;;  %v709_v34 = vmax.f32 %v653_v27, 0.0 }
 0x1db   : > { %v648_v33 = vadd.f32 %v997_v25, %v647_v32  ;;  %v707_v36 = vmax.f32 %v645_v29, 0.0 }
 0x1dc   : > { %v710_v35 = vmax.f32 %v656_v31, 0.0 }
 0x1dd   : > { %v708_v37 = vmax.f32 %v648_v33, 0.0 }
 0x1de   : > { %v740_v38 = vpack.c.bf16 %v710_v35, %v709_v34 }
 0x1df   : > { %v739_v39 = vpack.c.bf16 %v708_v37, %v707_v36  ;;  %v1119_v40 = vpop.f32.mrb[4].mxu1 }
 0x1e0   : > { %v669_v41 = vadd.f32 %v1119_v40, %v997_v25  ;;  %v660_v42 = vpop.f32.mrb[5].mxu1 }
 0x1e1   : > { %v661_v43 = vadd.f32 %v997_v25, %v660_v42  ;;  %v1120_v44 = vpop.f32.mrb[6].mxu1  ;;  %1145 = vmatprep.mubr.bf16.mxu0 %v739_v39 }
 0x1e2   : > { %v672_v45 = vadd.f32 %v1120_v44, %v997_v25  ;;  %v663_v46 = vpop.f32.mrb[7].mxu1  ;;  %1146 = vmatmul.mubr.bf16.vlgmr.msra.gmra.mrb[16].mxu0 %v740_v38  ;;  %v713_v48 = vmax.f32 %v669_v41, 0.0 }
 0x1e3   : > { %v664_v47 = vadd.f32 %v997_v25, %v663_v46  ;;  %v711_v50 = vmax.f32 %v661_v43, 0.0 }
 0x1e4   : > { %v714_v49 = vmax.f32 %v672_v45, 0.0 }
 0x1e5   : > { %v712_v51 = vmax.f32 %v664_v47, 0.0 }
 0x1e6   : > { %v742_v52 = vpack.c.bf16 %v714_v49, %v713_v48 }
 0x1e7   : > { %v741_v53 = vpack.c.bf16 %v712_v51, %v711_v50  ;;  %v1123_v54 = vpop.f32.mrb[8].mxu1 }
 0x1e8   : > { %v685_v55 = vadd.f32 %v1123_v54, %v997_v25  ;;  %v676_v56 = vpop.f32.mrb[9].mxu1 }
 0x1e9   : > { %v677_v57 = vadd.f32 %v997_v25, %v676_v56  ;;  %v1124_v58 = vpop.f32.mrb[10].mxu1  ;;  %1149 = vmatprep.mubr.bf16.mxu0 %v741_v53 }
 0x1ea   : > { %v688_v59 = vadd.f32 %v1124_v58, %v997_v25  ;;  %v679_v60 = vpop.f32.mrb[11].mxu1  ;;  %1150 = vmatmul.mubr.bf16.gmra.mrb[20].mxu0 %v742_v52  ;;  %v717_v62 = vmax.f32 %v685_v55, 0.0 }
 0x1eb   : > { %v680_v61 = vadd.f32 %v997_v25, %v679_v60  ;;  %v715_v0 = vmax.f32 %v677_v57, 0.0 }
 0x1ec   : > { %v718_v63 = vmax.f32 %v688_v59, 0.0 }
 0x1ed   : > { %v716_v1 = vmax.f32 %v680_v61, 0.0 }
 0x1ee   : > { %v744_v2 = vpack.c.bf16 %v718_v63, %v717_v62 }
 0x1ef   : > { %v743_v3 = vpack.c.bf16 %v716_v1, %v715_v0  ;;  %v1127_v4 = vpop.f32.mrb[12].mxu1 }
 0x1f0   : > { %v701_v5 = vadd.f32 %v1127_v4, %v997_v25  ;;  %v692_v6 = vpop.f32.mrb[13].mxu1 }
 0x1f1   : > { %v693_v7 = vadd.f32 %v997_v25, %v692_v6  ;;  %v1128_v8 = vpop.f32.mrb[14].mxu1  ;;  %1153 = vmatprep.mubr.bf16.mxu1 %v743_v3 }
 0x1f2   : > { %v704_v9 = vadd.f32 %v1128_v8, %v997_v25  ;;  %v695_v10 = vpop.f32.mrb[15].mxu1  ;;  %1154 = vmatmul.mubr.bf16.vlgmr.msra.gmra.mrb[16].mxu1 %v744_v2  ;;  %v721_v12 = vmax.f32 %v701_v5, 0.0 }
 0x1f3   : > { %v696_v11 = vadd.f32 %v997_v25, %v695_v10  ;;  %v719_v14 = vmax.f32 %v693_v7, 0.0 }
 0x1f4   : > { %v722_v13 = vmax.f32 %v704_v9, 0.0 }
 0x1f5   : > { %v720_v15 = vmax.f32 %v696_v11, 0.0 }
 0x1f6   : > { %v746_v16 = vpack.c.bf16 %v722_v13, %v721_v12 }
 0x1f7   : > { %v745_v17 = vpack.c.bf16 %v720_v15, %v719_v14 }
 0x1f9   : > { %1157 = vmatprep.mubr.bf16.mxu1 %v745_v17 }
 0x1fa   : > { %1158 = vmatmul.mubr.bf16.gmra.mrb[20].mxu1 %v746_v16 }
 0x2b5   : > { %v1147_v19 = vpop.f32.mrb[16].mxu0 }
 0x2b6   : > { %v845_v20 = vadd.f32 %v1147_v19, %v1006_v18  ;;  %v836_v21 = vpop.f32.mrb[17].mxu0 }
 0x2b7   : > { %v837_v22 = vadd.f32 %v1006_v18, %v836_v21  ;;  %v1148_v23 = vpop.f32.mrb[18].mxu0 }
 0x2b8   : > { %901 = vst [vmem:[%s1410_s13 + $0x10] sm:$0xff] %v845_v20  ;;  %v848_v24 = vadd.f32 %v1148_v23, %v1006_v18  ;;  %v839_v25 = vpop.f32.mrb[19].mxu0 }
 0x2b9   : > { %899 = vst [vmem:[%s1410_s13] sm:$0xff] %v837_v22  ;;  %v840_v26 = vadd.f32 %v1006_v18, %v839_v25 }
 0x2ba   : > { %902 = vst [vmem:[%s1410_s13 + $0x18] sm:$0xff] %v848_v24 }
 0x2bb   : > { %900 = vst [vmem:[%s1410_s13 + $0x8] sm:$0xff] %v840_v26 }
 0x2bd   : > { %v1151_v27 = vpop.f32.mrb[20].mxu0 }
 0x2be   : > { %v861_v28 = vadd.f32 %v1151_v27, %v1006_v18  ;;  %v852_v29 = vpop.f32.mrb[21].mxu0 }
 0x2bf   : > { %v853_v30 = vadd.f32 %v1006_v18, %v852_v29  ;;  %v1152_v31 = vpop.f32.mrb[22].mxu0 }
 0x2c0   : > { %905 = vst [vmem:[%s1410_s13 + $0x30] sm:$0xff] %v861_v28  ;;  %v864_v32 = vadd.f32 %v1152_v31, %v1006_v18  ;;  %v855_v33 = vpop.f32.mrb[23].mxu0 }
 0x2c1   : > { %903 = vst [vmem:[%s1410_s13 + $0x20] sm:$0xff] %v853_v30  ;;  %v856_v34 = vadd.f32 %v1006_v18, %v855_v33 }
 0x2c2   : > { %906 = vst [vmem:[%s1410_s13 + $0x38] sm:$0xff] %v864_v32 }
 0x2c3   : > { %904 = vst [vmem:[%s1410_s13 + $0x28] sm:$0xff] %v856_v34 }
 0x2c5   : > { %v1155_v35 = vpop.f32.mrb[16].mxu1 }
 0x2c6   : > { %v877_v36 = vadd.f32 %v1155_v35, %v1006_v18  ;;  %v868_v37 = vpop.f32.mrb[17].mxu1 }
 0x2c7   : > { %v869_v38 = vadd.f32 %v1006_v18, %v868_v37  ;;  %v1156_v39 = vpop.f32.mrb[18].mxu1 }
 0x2c8   : > { %909 = vst [vmem:[%s1410_s13 + $0x50] sm:$0xff] %v877_v36  ;;  %v880_v40 = vadd.f32 %v1156_v39, %v1006_v18  ;;  %v871_v41 = vpop.f32.mrb[19].mxu1 }
 0x2c9   : > { %907 = vst [vmem:[%s1410_s13 + $0x40] sm:$0xff] %v869_v38  ;;  %v872_v42 = vadd.f32 %v1006_v18, %v871_v41 }
 0x2ca   : > { %910 = vst [vmem:[%s1410_s13 + $0x58] sm:$0xff] %v880_v40 }
 0x2cb   : > { %908 = vst [vmem:[%s1410_s13 + $0x48] sm:$0xff] %v872_v42 }
 0x2cd   : > { %v1159_v43 = vpop.f32.mrb[20].mxu1 }
 0x2ce   : > { %v893_v44 = vadd.f32 %v1159_v43, %v1006_v18  ;;  %v884_v45 = vpop.f32.mrb[21].mxu1 }
 0x2cf   : > { %v885_v46 = vadd.f32 %v1006_v18, %v884_v45  ;;  %v1160_v47 = vpop.f32.mrb[22].mxu1 }
 0x2d0   : > { %913 = vst [vmem:[%s1410_s13 + $0x70] sm:$0xff] %v893_v44  ;;  %v896_v48 = vadd.f32 %v1160_v47, %v1006_v18  ;;  %v887_v49 = vpop.f32.mrb[23].mxu1 }
 0x2d1   : > { %911 = vst [vmem:[%s1410_s13 + $0x60] sm:$0xff] %v885_v46  ;;  %v888_v50 = vadd.f32 %v1006_v18, %v887_v49 }
 0x2d2   : > { %914 = vst [vmem:[%s1410_s13 + $0x78] sm:$0xff] %v896_v48 }
 0x2d3   : > { %912 = vst [vmem:[%s1410_s13 + $0x68] sm:$0xff] %v888_v50 }
 0x2d4 PF: > { %s17_s24 = sadd.s32 1, %s1223_s24  }
 0x2d5   : > { %p14_p4 = scmp.ge.s32.totalorder %s17_s24, 4  }
 0x2d7   :  { %16 = sbr.rel (!%p14_p4) target bundleno = 1 (0x1), region = 78 }

</bundles_post_ra>
